<compile_context>
chip_gen: v6e
topology: v6e:2x2x1
jax: 0.10.0
libtpu: 0.0.40
codegen_flags: <defaults>
</compile_context>

<pallas_src>
import jax
import jax.numpy as jnp
from jax.experimental import pallas as pl
from jax.experimental.pallas import tpu as pltpu


def _cdiv(a, b):
    return -(-a // b)


def _residual_pw_kernel(x_ref, w_ref, b_ref, o_ref):
    # x_ref / o_ref: (bn, C, tile_hw)   w_ref: (C, C) f32   b_ref: (C, 1) f32
    w = w_ref[...]
    bias = b_ref[...]
    # bn is a small static constant (capped in the wrapper), so a static
    # unroll keeps every matmul a plain 2-D MXU dot (no 3-D dot_general /
    # relayouting transposes).
    for i in range(x_ref.shape[0]):
        x = x_ref[i].astype(jnp.float32)                       # (C, tile_hw)
        y = jnp.dot(w, x, preferred_element_type=jnp.float32) + bias
        # Residual add in f32, single rounding step at the end.
        o_ref[i] = (x + y).astype(o_ref.dtype)


def _pick_tiles(n, c, hw, dtype_bytes, *, target_block_bytes=2 << 20, max_bn=32):
    """Pick (bn, tile_hw) so each (bn, C, tile_hw) activation block is ~1-2 MiB.

    tile_hw is a 128-multiple (or the full extent) for lane-dense stores, the
    per-block budget is respected for large C, and the grid keeps >= 2 steps
    where possible so both v7x TensorCores are used.
    """
    image_bytes = c * hw * dtype_bytes

    if image_bytes >= target_block_bytes:
        # Large image slab: tile the pixel axis inside a single image.
        bn = 1
        t = (target_block_bytes // (c * dtype_bytes)) // 128 * 128
        tile_hw = max(128, t)            # 128-lane floor even for enormous C
        if tile_hw >= hw:
            tile_hw = hw                 # full extent is always a legal block dim
    else:
        # Small image(s): pack whole images into one block to amortise the
        # per-grid-step overhead; a full (C, HW) slab is contiguous in NCHW.
        tile_hw = hw
        bn = max(1, min(n, max_bn, target_block_bytes // max(1, image_bytes)))

    # Keep at least two grid steps so a v7x megacore can split the work.
    steps = _cdiv(n, bn) * _cdiv(hw, tile_hw)
    if steps < 2:
        if n >= 2 and bn > 1:
            bn = _cdiv(n, 2)
        elif hw >= 256 and tile_hw >= hw:
            tile_hw = 128 * _cdiv(_cdiv(hw, 2), 128)
    return int(bn), int(tile_hw)


def _resident_spec(block_shape, nbytes):
    """BlockSpec for an operand whose block index never changes (weight/bias).

    Large resident operands never need the second pipeline buffer; request
    single-buffering when it is worth real VMEM. Falls back to the plain spec
    if this JAX version does not accept pipeline_mode.
    """
    index_map = lambda n, j: (0, 0)
    if nbytes >= (512 << 10) and hasattr(pl, "Buffered"):
        try:
            return pl.BlockSpec(block_shape, index_map,
                                pipeline_mode=pl.Buffered(1))
        except TypeError:
            pass
    return pl.BlockSpec(block_shape, index_map)


def residual_pointwise_conv(x_nchw, weight, bias, *, tile_hw=None, block_n=None,
                            donate_x=False):
    """out = x + Conv2d_1x1(x; weight, bias), x in NCHW (no relayout copies).

    weight: (C_out, C_in)  -- PyTorch 1x1 conv weight squeezed over the kernel.
    bias:   (C_out,)
    donate_x: only set True when the caller truly donates x; otherwise XLA
      inserts a defensive copy and the aliasing costs bandwidth.
    """
    N, C, H, W = x_nchw.shape
    assert weight.shape == (C, C) and bias.shape == (C,)
    HW = H * W
    dtype_bytes = jnp.dtype(x_nchw.dtype).itemsize

    auto_bn, auto_thw = _pick_tiles(N, C, HW, dtype_bytes)
    bn = auto_bn if block_n is None else int(block_n)
    thw = auto_thw if tile_hw is None else int(tile_hw)

    # NCHW -> (N, C, H*W) is a free reshape (same memory layout); pixels land
    # on the lane axis so both loads and stores are lane-dense.
    x3 = x_nchw.reshape(N, C, HW)
    # Weight/bias stay in f32 (no double rounding for bf16 x); they are tiny
    # relative to the activation stream, so the extra bytes are negligible.
    w = weight.astype(jnp.float32)
    b2 = bias.reshape(C, 1).astype(jnp.float32)

    grid = (_cdiv(N, bn), _cdiv(HW, thw))

    block_bytes = bn * C * thw * dtype_bytes
    w_bytes = C * C * 4
    # x + out blocks, double-buffered, plus weight/bias buffers and headroom.
    est_vmem = 4 * block_bytes + 2 * w_bytes + 4 * C * 4 + (1 << 20)

    params = dict(dimension_semantics=("parallel", "parallel"))
    if est_vmem > (12 << 20):
        # Raise the scoped-VMEM limit only when the smallest default (16 MiB
        # on v5e) would not fit; cap well under v7x's 64 MiB physical VMEM.
        params["vmem_limit_bytes"] = int(min(48 << 20, est_vmem))

    cost = pl.CostEstimate(
        flops=2 * N * HW * C * C,
        transcendentals=0,
        bytes_accessed=2 * N * C * HW * dtype_bytes + w_bytes + C * 4,
    )

    call_kwargs = {}
    if donate_x:
        call_kwargs["input_output_aliases"] = {0: 0}

    out3 = pl.pallas_call(
        _residual_pw_kernel,
        out_shape=jax.ShapeDtypeStruct((N, C, HW), x_nchw.dtype),
        grid=grid,
        in_specs=[
            pl.BlockSpec((bn, C, thw), lambda n, j: (n, 0, j)),
            _resident_spec((C, C), w_bytes),
            _resident_spec((C, 1), C * 4),
        ],
        out_specs=pl.BlockSpec((bn, C, thw), lambda n, j: (n, 0, j)),
        compiler_params=pltpu.CompilerParams(**params),
        cost_estimate=cost,
        **call_kwargs,
    )(x3, w, b2)

    # Free reshape back to NCHW.
    return out3.reshape(N, C, H, W)


if __name__ == "__main__":
    key = jax.random.PRNGKey(0)
    k_x, k_w, k_b = jax.random.split(key, 3)

    N, C, H, W = 2, 4, 16, 16
    x = jax.random.normal(k_x, (N, C, H, W), dtype=jnp.float32)

    # Deterministic parameters for the inner module m = Conv2d(C, C, 1, bias=True)
    weight = jax.random.normal(k_w, (C, C), dtype=jnp.float32) * 0.1
    bias = jax.random.normal(k_b, (C,), dtype=jnp.float32) * 0.1

    out = residual_pointwise_conv(x, weight, bias)
    out = jax.block_until_ready(out)

    # Reference: x + 1x1 conv (pure JAX), NCHW semantics.
    ref = x + (jnp.einsum("nchw,oc->nohw", x, weight)
               + bias.reshape(1, C, 1, 1))
    assert out.shape == (N, C, H, W)
    assert jnp.allclose(out, ref, atol=1e-5, rtol=1e-5)

    print("KERNEL_OK")
</pallas_src>

<mosaic_0001>
module attributes {stable_mosaic.version = 11 : i64} {
  func.func @_residual_pw_kernel(%arg0: i32, %arg1: i32, %arg2: memref<1x4x256xf32, #tpu.memory_space<vmem>>, %arg3: memref<4x4xf32, #tpu.memory_space<vmem>>, %arg4: memref<4x1xf32, #tpu.memory_space<vmem>>, %arg5: memref<1x4x256xf32, #tpu.memory_space<vmem>>) attributes {dimension_semantics = [#tpu.dimension_semantics<parallel>, #tpu.dimension_semantics<parallel>], iteration_bounds = array<i64: 2, 1>, scalar_prefetch = 0 : i64, scratch_operands = 0 : i64, tpu.core_type = #tpu.core_type<tc>, window_params = [{transform_indices = @transform_0, window_bounds = array<i64: 1, 4, 256>}, {pipeline_mode = #tpu.pipeline_mode<synchronous>, transform_indices = @transform_1, window_bounds = array<i64: 4, 4>}, {pipeline_mode = #tpu.pipeline_mode<synchronous>, transform_indices = @transform_2, window_bounds = array<i64: 4, 1>}, {transform_indices = @transform_3, window_bounds = array<i64: 1, 4, 256>}]} {
    %c0 = arith.constant 0 : index
    %c0_0 = arith.constant 0 : index
    %0 = vector.load %arg3[%c0, %c0_0] : memref<4x4xf32, #tpu.memory_space<vmem>>, vector<4x4xf32>
    %c0_1 = arith.constant 0 : index
    %c0_2 = arith.constant 0 : index
    %1 = vector.load %arg4[%c0_1, %c0_2] : memref<4x1xf32, #tpu.memory_space<vmem>>, vector<4x1xf32>
    %c0_3 = arith.constant 0 : index
    %c0_4 = arith.constant 0 : index
    %c0_5 = arith.constant 0 : index
    %2 = vector.load %arg2[%c0_3, %c0_4, %c0_5] : memref<1x4x256xf32, #tpu.memory_space<vmem>>, vector<1x4x256xf32>
    %3 = vector.shape_cast %2 : vector<1x4x256xf32> to vector<4x256xf32>
    %cst = arith.constant dense<0.000000e+00> : vector<4x256xf32>
    %4 = tpu.matmul %0, %3, %cst {dimension_numbers = #tpu.dot_dimension_numbers<[1], [0], [0], [1], [0, 0, 1, 1], [], []>} : vector<4x4xf32>, vector<4x256xf32>, vector<4x256xf32> -> vector<4x256xf32>
    %5 = vector.broadcast %1 : vector<4x1xf32> to vector<4x256xf32>
    %6 = arith.addf %4, %5 : vector<4x256xf32>
    %7 = arith.addf %3, %6 : vector<4x256xf32>
    %c0_6 = arith.constant 0 : index
    %c0_7 = arith.constant 0 : index
    %c0_8 = arith.constant 0 : index
    %8 = vector.load %arg5[%c0_6, %c0_7, %c0_8] : memref<1x4x256xf32, #tpu.memory_space<vmem>>, vector<1x4x256xf32>
    %9 = vector.shape_cast %8 : vector<1x4x256xf32> to vector<4x256xf32>
    %10 = vector.shape_cast %7 : vector<4x256xf32> to vector<1x4x256xf32>
    tpu.vector_store %arg5[%c0_6, %c0_7, %c0_8], %10 {strides = array<i32>} : memref<1x4x256xf32, #tpu.memory_space<vmem>>, vector<1x4x256xf32>,
    return
  }
  func.func @transform_0(%arg0: i32, %arg1: i32) -> (i32, i32, i32) {
    %c0_i32 = arith.constant 0 : i32
    %c0_i32_0 = arith.constant 0 : i32
    return %arg0, %c0_i32, %arg1 : i32, i32, i32
  }
  func.func @transform_1(%arg0: i32, %arg1: i32) -> (i32, i32) {
    %c0_i32 = arith.constant 0 : i32
    %c0_i32_0 = arith.constant 0 : i32
    %c0_i32_1 = arith.constant 0 : i32
    return %c0_i32, %c0_i32_0 : i32, i32
  }
  func.func @transform_2(%arg0: i32, %arg1: i32) -> (i32, i32) {
    %c0_i32 = arith.constant 0 : i32
    %c0_i32_0 = arith.constant 0 : i32
    %c0_i32_1 = arith.constant 0 : i32
    return %c0_i32, %c0_i32_0 : i32, i32
  }
  func.func @transform_3(%arg0: i32, %arg1: i32) -> (i32, i32, i32) {
    %c0_i32 = arith.constant 0 : i32
    %c0_i32_0 = arith.constant 0 : i32
    return %arg0, %c0_i32, %arg1 : i32, i32, i32
  }
}

</mosaic_0001>

<bundles_post_ra>
// kernel: tpu_custom_call.1
= control target key start
LH: loop header
LB: loop body
LE: loop exit
PB: predicated region body
PF: predicated region fallthrough
CT: control target
= control target key end

     0   :  { %8 = vsyncpa [#allocation3], 0  ;;  %s764_s0 = inlined_call_operand.hbm [shape: f32[2,4,256], index: 0, kind: input, shape index: {}]   ;;  %s765_s1 = inlined_call_operand.vmem [shape: f32[4,4], index: 1, kind: input, shape index: {}]   ;;  %s766_s2 = inlined_call_operand.vmem [shape: f32[4,1], index: 2, kind: input, shape index: {}]   ;;  %s767_s3 = inlined_call_operand.hbm [shape: f32[2,4,256], index: 3, kind: output, shape index: {}]  }
   0x1   :  { %10 = vsyncpa [#allocation3 + $0x1], 0 }
   0x2   :  { %11 = vsyncpa [#allocation4], 0 }
   0x3   :  { %13 = vsyncpa [#allocation4 + $0x1], 0  ;;  %s624_s12 = smov 0   ;;  %s626_s13 = smov 0  }
   0x4   :  { %s628_s14 = smov 0   ;;  %s630_s15 = smov 0  }
   0x5   :  { %s632_s16 = smov 0   ;;  %s634_s17 = smov 0  }
   0x6 LB: > { %s404_s18 = sadd.s32 4294967295, %s598_s17   ;;  %s405_s19 = sadd.s32 4294967294, %s598_s17   ;;  %s598_s17 = sphi %s634_s17, %s19_s17   ;;  %s594_s16 = sphi %s632_s16, %s779_s16   ;;  %s590_s15 = sphi %s630_s15, %s778_s15   ;;  %s586_s14 = sphi %s628_s14, %s777_s14   ;;  %s582_s13 = sphi %s626_s13, %s776_s13   ;;  %s578_s12 = sphi %s624_s12, %s775_s12  }
   0x7   : > { %s31_s20 = sadd.s32 1, %s594_s16  ;;  %s40_s21 = sadd.s32 1, %s586_s14 }
   0x8   : > { %p33_p0 = scmp.ge.s32.totalorder %s31_s20, 2  ;;  %p47_p1 = scmp.ne.s32.totalorder %s586_s14, %s582_s13 }
   0x9   : > { %p48_p2 = scmp.eq.s32.totalorder %s598_s17, 0  ;;  %p53_p3 = scmp.ne.s32.totalorder %s582_s13, %s578_s12 }
   0xa   : > { %s781_s20 = smov (%p33_p0, %s31_s20), 0  ;;  %p54_p5 = scmp.eq.s32.totalorder %s404_s18, 0 }
   0xb   : > { %p665_p4 = por %p48_p2, %p47_p1  ;;  %s35_s23 = ssub.s32 %s594_s16, %s781_s20 }
   0xc   : > { %p121_p6 = scmp.eq.s32.totalorder %s404_s18, 1  ;;  %p38_p7 = scmp.eq.s32.totalorder %s35_s23, 0 }
   0xd   : > { %p671_p8 = por %p54_p5, %p53_p3  ;;  %p127_p10 = scmp.eq.s32.totalorder %s405_s19, 1 }
   0xe   : > { %p675_p9 = por %p121_p6, %p47_p1  ;;  %p436_p13 = scmp.lt.s32.totalorder %s598_s17, 2 }
   0xf   : > { %s680_s26 = scalar_select %p38_p7, %s586_s14, %s40_s21  }
  0x10   : > { %p682_p11 = por %p127_p10, %p53_p3  ;;  %s153_s28 = sand.u32 1, %s586_s14  }
  0x11   : > { %s408_s29 = sshll.u32 %s153_s28, 3  ;;  %s422_s30 = sshll.u32 %s594_s16, 7 }
  0x12   : > { %s771_s27 = scalar_select %p682_p11, 1, 0 }
  0x13   : > { %s165_s6 = scalar_lea.hbm %s764_s0, %s422_s30  ;;  %s157_s7 = scalar_lea.vmem [#allocation2], %s408_s29 }
  0x14   : > { %s167_s8 = sshll.u32 %s157_s7, 4  ;;  %p695_p0 = pnand %p436_p13, %p665_p4  ;;  %s168_s8 = int_to_ptr.vmem [resolvable:$true] %s167_s8 }
  0x15   : > { %p411_p1 = scmp.ge.s32.totalorder %s598_s17, 1  ;;  %p172_p2 = scmp.lt.s32.totalorder %s598_s17, 3 }
  0x16   : > { %s154_s10 = scalar_lea.sflag [#allocation3], %s153_s28  ;;  %p492_p3 = pneg %p695_p0 }
  0x17   : > { %s503_s11 = scalar_lea.vmem %s168_s8, 128  ;;  %s600_s18 = smov [#allocation2]  }
  0x18   : > { %p504_p5 = scmp.ne.s32.totalorder %s168_s8, %s503_s11  ;;  %s508_s19 = sshll.u32 %s600_s18, 4  ;;  %s509_s19 = int_to_ptr.vmem [resolvable:$false] %s508_s19 }
  0x19   : > { %s510_s21 = scalar_lea.vmem %s509_s19, 256  ;;  %p511_p10 = scmp.lt.s32.totalorder %s168_s8, %s509_s19 }
  0x1a   : > { %p506_p6 = pnand %p504_p5, %p492_p3  ;;  %p512_p12 = scmp.lt.s32.totalorder %s510_s21, %s503_s11 }
  0x1c   : > { %p507_p7 = pneg %p506_p6  ;;  %p513_p4 = por %p512_p12, %p511_p10 }
  0x1e   : > { %p514_p13 = pnand %p513_p4, %p507_p7 }
  0x20   : > { %517 = shalt.err (!%p514_p13)
}
  0x21   : > { %431 = dma.hbm_to_vmem [thread:$0]  (!%p695_p0), %s165_s6, 128, %s168_s8, %s154_s10  }
  0x22   : > { %p173_p11 = pnand %p411_p1, %p172_p2 }
  0x23   : > { %s710_s22 = sand.u32 (!%p173_p11), 1, %s582_s13  }
  0x24   : > { %176 = sbr.rel (%p173_p11) target bundleno = 261 (0x105), region = 32  ;;  %s412_s23 = sshll.u32 (!%p173_p11), %s710_s22, 3 }
  0x25   : > { %s179_s28 = scalar_lea.sflag (!%p173_p11), [#allocation3], %s710_s22  ;;  %s182_s29 = scalar_lea.vmem (!%p173_p11), [#allocation2], %s412_s23 }
  0x29   : > { %569 = dma.done.wait (%p671_p8), %s179_s28, 128  }
  0x2a   : > { %571 = vsyncadd (%p671_p8), %s179_s28, 4294967168  ;;  %v601_v0 = vmov 0.0   ;;  %v602_v1 = vmov 0   ;;  %v209_v2 = vld [vmem:[%s182_s29] sm:$0xff]  ;;  %vm221_vm0 = vcmask 1043456   ;;  %vm217_vm1 = vcmask 31744  }
  0x2b   : > { %290 = vmatprep.mubr.f32.mxu0 %v601_v0  ;;  %488 = vset.pattern.permute.xlu0 %v602_v1  ;;  %v208_v3 = vld [vmem:[%s766_s2] sm:$0xf]  ;;  %v216_v4 = vcombine.high %v209_v2, %v209_v2  ;;  %s423_s24 = sshll.u32 %s590_s15, 7  ;;  %s204_s7 = scalar_lea.vmem [#allocation5], %s412_s23 }
  0x2c   : > { %212 = vperm.xlu0 %488, %v208_v3   ;;  %v207_v5 = vld [vmem:[%s765_s1] sm:$0xf]  ;;  %s320_s8 = sshll.u32 %s204_s7, 4  ;;  %s318_s11 = scalar_lea.hbm %s767_s3, %s423_s24  ;;  %s321_s8 = int_to_ptr.vmem [resolvable:$true] %s320_s8 }
  0x2d   : > { %414 = vmatprep.subr.msk.mxu0 %vm221_vm0, %v216_v4  ;;  %s304_s18 = scalar_lea.sflag [#allocation4], %s710_s22  ;;  %s518_s19 = scalar_lea.vmem %s321_s8, 128 }
  0x2e   : > { %415 = vmatpush1.msk.msra.mxu0 %vm221_vm0, %v209_v2  ;;  %p519_p8 = scmp.ne.s32.totalorder %s321_s8, %s518_s19  ;;  %s603_s21 = smov [#allocation5]  }
  0x2f   : > { %416 = vmatmul.mubr.msk.f32.vlgmr.msra.gmra.mxu0 %vm217_vm1, %v207_v5  ;;  %s522_s28 = sshll.u32 %s603_s21, 4  ;;  %s523_s28 = int_to_ptr.vmem [resolvable:$false] %s522_s28 }
  0x30   : > { %p520_p11 = pnand %p519_p8, %p675_p9  ;;  %s524_s15 = scalar_lea.vmem %s523_s28, 256 }
  0x31   : > { %p525_p0 = scmp.lt.s32.totalorder %s321_s8, %s523_s28  ;;  %p526_p1 = scmp.lt.s32.totalorder %s524_s15, %s518_s19 }
  0x32   : > { %p521_p12 = pneg %p520_p11 }
  0x33   : > { %p527_p2 = por %p526_p1, %p525_p0 }
  0x35   : > { %p528_p3 = pnand %p527_p2, %p521_p12 }
  0xa7   : > { %v213_v6 = vpop.permute.xlu0 %212 }
  0xef   : > { %v292_v7 = vpop.f32.mrf.mxu0 }
  0xf0   : > { %v293_v9 = vadd.f32 %v292_v7, %v213_v6 }
  0xf1   : > { %v294_v8 = vpop.f32.mrf.mxu0 }
  0xf2   : > { %v295_v10 = vadd.f32 %v294_v8, %v213_v6 }
  0xf4   : > { %v299_v11 = vcombine.low %v293_v9, %v295_v10 }
  0xf6   : > { %v301_v12 = vadd.f32 %v299_v11, %v209_v2 }
  0xf8   : > { %302 = vst [vmem:[%s204_s7] sm:$0xff] %v301_v12 }
  0xf9   : > { %531 = shalt.err (!%p528_p3)
}
  0xfa   : > { %s532_s23 = scalar_lea.hbm %s318_s11, 128  ;;  %s536_s30 = scalar_lea.hbm %s767_s3, 256 }
  0xfb   : > { %p533_p5 = scmp.ne.s32.totalorder %s318_s11, %s532_s23  ;;  %p537_p10 = scmp.lt.s32.totalorder %s318_s11, %s767_s3 }
  0xfc   : > { %p538_p4 = scmp.lt.s32.totalorder %s536_s30, %s532_s23 }
  0xfd   : > { %p534_p6 = pnand %p533_p5, %p675_p9 }
  0xfe   : > { %p539_p13 = por %p538_p4, %p537_p10 }
  0xff   : > { %p535_p7 = pneg %p534_p6 }
 0x101   : > { %p540_p8 = pnand %p539_p13, %p535_p7 }
 0x103   : > { %543 = shalt.err (!%p540_p8)
}
 0x104   : > { %426 = dma.vmem_to_hbm [thread:$0]  (%p675_p9), %s321_s8, 128, %s318_s11, %s304_s18  }
 0x105 PF: > { %s332_s6 = sand.u32 1, %s578_s12   ;;  %p773_p11 = scmp.ne.s32.totalorder %s771_s27, 0 }
 0x106   : > { %p774_p12 = scmp.ge.s32.totalorder %s598_s17, 2  ;;  %s333_s24 = scalar_lea.sflag [#allocation4], %s332_s6 }
 0x108   : > { %p433_p0 = pnand %p774_p12, %p773_p11 }
 0x10a   : > { %p434_p1 = pneg %p433_p0 }
 0x10c   : > { %573 = dma.done.wait (%p434_p1), %s333_s24, 128  }
 0x10d   : > { %575 = vsyncadd (%p434_p1), %s333_s24, 4294967168  ;;  %s19_s17 = sadd.s32 1, %s598_s17   ;;  %s775_s12 = smov %s582_s13 }
 0x10e   : > { %p16_p2 = scmp.ge.s32.totalorder %s19_s17, 4   ;;  %s776_s13 = smov %s586_s14 }
 0x10f   : > { %s777_s14 = smov %s680_s26  ;;  %s778_s15 = smov %s594_s16 }
 0x110   : > { %s779_s16 = smov %s781_s20  ;;  %18 = sbr.rel (!%p16_p2) target bundleno = 6 (0x6), region = 77 }
 0x115   :  { %338 = vsyncpa [#allocation3], 1 }
 0x116   :  { %340 = vsyncpa [#allocation3 + $0x1], 1 }
 0x117   :  { %341 = vsyncpa [#allocation4], 1 }
 0x118   :  { %343 = vsyncpa [#allocation4 + $0x1], 1 }

</bundles_post_ra>
